<compile_context>
chip_gen: v6e
topology: v6e:2x2x1
jax: 0.10.0
libtpu: 0.0.40
codegen_flags: <defaults>
</compile_context>

<pallas_src>
import functools

import jax
import jax.numpy as jnp
from jax.experimental import pallas as pl
from jax.experimental.pallas import tpu as pltpu


def _ce2d_kernel(logits_ref, target_ref, loss_ref, cnt_ref, *,
                 ignore_label, hw, tile):
    """Per grid step: one batch element b, one pixel tile j.

    logits_ref: (1, C, TILE)   target_ref: (1, 1, TILE) int32
    loss_ref:   (1, 1, TILE) f32 partial (resident across the j axis)
    cnt_ref:    (1, 1, TILE) i32 partial (resident across the j axis)
    """
    j = pl.program_id(1)

    # New batch element -> reset the resident per-lane accumulators.
    @pl.when(j == 0)
    def _():
        loss_ref[...] = jnp.zeros_like(loss_ref)
        cnt_ref[...] = jnp.zeros_like(cnt_ref)

    logits = logits_ref[0].astype(jnp.float32)       # (C, TILE)
    tgt = target_ref[0]                              # (1, TILE) int32

    # Validity mask: ignore_label / negative labels / ragged tail of H*W.
    lane = jax.lax.broadcasted_iota(jnp.int32, tgt.shape, 1)      # (1, TILE)
    in_bounds = (j * tile + lane) < hw
    valid = (tgt >= 0) & (tgt != ignore_label) & in_bounds        # (1, TILE)

    # Numerically-stable log-sum-exp over the class (sublane) axis.
    m = jnp.max(logits, axis=0, keepdims=True)                    # (1, TILE)
    lse = m + jnp.log(jnp.sum(jnp.exp(logits - m), axis=0, keepdims=True))

    # Target-class logit via masked sublane reduce (no one-hot temporary).
    c_iota = jax.lax.broadcasted_iota(jnp.int32, logits.shape, 0)  # (C, TILE)
    correct = jnp.sum(jnp.where(c_iota == tgt, logits, 0.0),
                      axis=0, keepdims=True)                       # (1, TILE)

    per_px = jnp.where(valid, lse - correct, 0.0)                  # (1, TILE)

    # Pure element-wise (VPU) per-lane accumulation; reduce in the wrapper.
    loss_ref[...] += per_px[None]
    cnt_ref[...] += valid[None].astype(jnp.int32)


def cross_entropy_2d(predict, target, *, ignore_label=255, size_average=True,
                     temperature=None, weight=None, tile_hw=8192):
    """predict: (n, c, h, w) float (f32 or bf16); target: (n, h, w) int.

    Returns a scalar loss matching CrossEntropy2d.forward (weight=None).
    """
    # TODO(synk): per-class `weight` rescaling not implemented (module default is None).
    # TODO(synk): `temperature` divides integer targets in the original module
    #             (a no-op/bug upstream; default None) -- not implemented.
    del temperature, weight

    n, c, h, w = predict.shape
    assert target.shape == (n, h, w)
    hw = h * w

    # Free, layout-preserving reshapes (no transpose, no padding).
    logits = predict.reshape(n, c, hw)
    tgt = target.reshape(n, 1, hw).astype(jnp.int32)

    # Pick the lane tile: as big as possible under a ~4 MiB per-buffer budget,
    # multiple of 128 (or exactly hw if hw fits in a single tile).
    itemsize = jnp.dtype(predict.dtype).itemsize
    budget_lanes = (4 * 1024 * 1024) // max(1, c * itemsize)
    t_cap = max(128, min(tile_hw, (budget_lanes // 128) * 128))
    if hw <= t_cap:
        t = hw          # full-dim block (allowed even if not a multiple of 128)
    else:
        t = t_cap       # multiple of 128; ragged tail masked in-kernel
    nj = pl.cdiv(hw, t)

    kernel = functools.partial(_ce2d_kernel, ignore_label=ignore_label,
                               hw=hw, tile=t)

    loss_part, cnt_part = pl.pallas_call(
        kernel,
        out_shape=(
            jax.ShapeDtypeStruct((n, 1, t), jnp.float32),
            jax.ShapeDtypeStruct((n, 1, t), jnp.int32),
        ),
        grid_spec=pltpu.PrefetchScalarGridSpec(
            num_scalar_prefetch=0,
            grid=(n, nj),
            in_specs=[
                pl.BlockSpec((1, c, t), lambda b, j: (b, 0, j)),
                pl.BlockSpec((1, 1, t), lambda b, j: (b, 0, j)),
            ],
            out_specs=[
                pl.BlockSpec((1, 1, t), lambda b, j: (b, 0, 0)),
                pl.BlockSpec((1, 1, t), lambda b, j: (b, 0, 0)),
            ],
        ),
        compiler_params=pltpu.CompilerParams(
            dimension_semantics=("parallel", "arbitrary")),
    )(logits, tgt)

    loss_sum = jnp.sum(loss_part)
    count = jnp.sum(cnt_part)            # exact int32 valid-pixel count
    count_f = count.astype(jnp.float32)

    # F.cross_entropy with size_average=True -> mean over valid pixels;
    # the torch module returns 0 when there are no valid pixels.
    denom = jnp.where(count > 0, count_f, 1.0)
    if size_average:
        loss = jnp.where(count > 0, loss_sum / denom, 0.0)
    else:
        loss = jnp.where(count > 0, loss_sum, 0.0)
    return loss


def _reference(predict, target, ignore_label=255):
    """Pure-JAX reference for verification."""
    n, c, h, w = predict.shape
    logits = jnp.transpose(predict, (0, 2, 3, 1)).reshape(-1, c).astype(jnp.float32)
    tgt = target.reshape(-1).astype(jnp.int32)
    valid = (tgt >= 0) & (tgt != ignore_label)
    logp = jax.nn.log_softmax(logits, axis=-1)
    safe_t = jnp.clip(tgt, 0, c - 1)
    nll = -jnp.take_along_axis(logp, safe_t[:, None], axis=-1)[:, 0]
    nll = jnp.where(valid, nll, 0.0)
    cnt = jnp.sum(valid)
    return jnp.where(cnt > 0, jnp.sum(nll) / cnt, 0.0)


if __name__ == "__main__":
    key = jax.random.PRNGKey(0)

    # --- Test 1: small single-tile case (n=2, c=4, 16x16) -------------------
    k1, k2, k3, k4 = jax.random.split(key, 4)
    n, c, h, w = 2, 4, 16, 16
    predict = jax.random.normal(k1, (n, c, h, w), dtype=jnp.float32)
    target = jax.random.randint(k2, (n, h, w), 0, c, dtype=jnp.int32)
    ignore_mask = jax.random.bernoulli(k3, 0.2, (n, h, w))
    target = jnp.where(ignore_mask, 255, target)
    neg_mask = jax.random.bernoulli(k4, 0.1, (n, h, w))
    target = jnp.where(neg_mask, -1, target)

    loss = cross_entropy_2d(predict, target, ignore_label=255, size_average=True)
    loss = jax.block_until_ready(loss)
    ref = _reference(predict, target, ignore_label=255)
    assert jnp.allclose(loss, ref, atol=1e-5, rtol=1e-5), (loss, ref)

    # --- Test 2: multi-tile with ragged tail (forces in-kernel tail masking) -
    k5, k6, k7 = jax.random.split(k4, 3)
    n2, c2, h2, w2 = 2, 5, 12, 20          # hw = 240; tile_hw=128 -> ragged tail
    predict2 = jax.random.normal(k5, (n2, c2, h2, w2), dtype=jnp.float32)
    target2 = jax.random.randint(k6, (n2, h2, w2), 0, c2, dtype=jnp.int32)
    ignore_mask2 = jax.random.bernoulli(k7, 0.25, (n2, h2, w2))
    target2 = jnp.where(ignore_mask2, 255, target2)

    loss2 = cross_entropy_2d(predict2, target2, ignore_label=255,
                             size_average=True, tile_hw=128)
    loss2 = jax.block_until_ready(loss2)
    ref2 = _reference(predict2, target2, ignore_label=255)
    assert jnp.allclose(loss2, ref2, atol=1e-5, rtol=1e-5), (loss2, ref2)

    print("KERNEL_OK")
</pallas_src>

<mosaic_0001>
module attributes {stable_mosaic.version = 11 : i64} {
  func.func @_ce2d_kernel(%arg0: i32, %arg1: i32, %arg2: memref<1x4x256xf32, #tpu.memory_space<vmem>>, %arg3: memref<1x1x256xi32, #tpu.memory_space<vmem>>, %arg4: memref<1x1x256xf32, #tpu.memory_space<vmem>>, %arg5: memref<1x1x256xi32, #tpu.memory_space<vmem>>) attributes {dimension_semantics = [#tpu.dimension_semantics<parallel>, #tpu.dimension_semantics<arbitrary>], iteration_bounds = array<i64: 2, 1>, scalar_prefetch = 0 : i64, scratch_operands = 0 : i64, tpu.core_type = #tpu.core_type<tc>, window_params = [{transform_indices = @transform_0, window_bounds = array<i64: 1, 4, 256>}, {transform_indices = @transform_1, window_bounds = array<i64: 1, 1, 256>}, {transform_indices = @transform_2, window_bounds = array<i64: 1, 1, 256>}, {transform_indices = @transform_3, window_bounds = array<i64: 1, 1, 256>}]} {
    %c0_i32 = arith.constant 0 : i32
    %0 = arith.cmpi eq, %arg1, %c0_i32 : i32
    %1 = arith.extui %0 : i1 to i32
    %c0_i32_0 = arith.constant 0 : i32
    %2 = arith.cmpi ne, %1, %c0_i32_0 : i32
    scf.if %2 {
      %cst_24 = arith.constant 0.000000e+00 : f32
      %47 = vector.broadcast %cst_24 : f32 to vector<1x1x256xf32>
      %c0_25 = arith.constant 0 : index
      %c0_26 = arith.constant 0 : index
      %c0_27 = arith.constant 0 : index
      %48 = vector.load %arg4[%c0_25, %c0_26, %c0_27] : memref<1x1x256xf32, #tpu.memory_space<vmem>>, vector<1x1x256xf32>
      tpu.vector_store %arg4[%c0_25, %c0_26, %c0_27], %47 {strides = array<i32>} : memref<1x1x256xf32, #tpu.memory_space<vmem>>, vector<1x1x256xf32>,
      %c0_i32_28 = arith.constant 0 : i32
      %49 = vector.broadcast %c0_i32_28 : i32 to vector<1x1x256xi32>
      %c0_29 = arith.constant 0 : index
      %c0_30 = arith.constant 0 : index
      %c0_31 = arith.constant 0 : index
      %50 = vector.load %arg5[%c0_29, %c0_30, %c0_31] : memref<1x1x256xi32, #tpu.memory_space<vmem>>, vector<1x1x256xi32>
      tpu.vector_store %arg5[%c0_29, %c0_30, %c0_31], %49 {strides = array<i32>} : memref<1x1x256xi32, #tpu.memory_space<vmem>>, vector<1x1x256xi32>,
    } else {
    }
    %c0 = arith.constant 0 : index
    %c0_1 = arith.constant 0 : index
    %c0_2 = arith.constant 0 : index
    %3 = vector.load %arg2[%c0, %c0_1, %c0_2] : memref<1x4x256xf32, #tpu.memory_space<vmem>>, vector<1x4x256xf32>
    %4 = vector.shape_cast %3 : vector<1x4x256xf32> to vector<4x256xf32>
    %c0_3 = arith.constant 0 : index
    %c0_4 = arith.constant 0 : index
    %c0_5 = arith.constant 0 : index
    %5 = vector.load %arg3[%c0_3, %c0_4, %c0_5] : memref<1x1x256xi32, #tpu.memory_space<vmem>>, vector<1x1x256xi32>
    %6 = vector.shape_cast %5 : vector<1x1x256xi32> to vector<1x256xi32>
    %7 = tpu.iota {dimensions = array<i32: 1>} : vector<1x256xi32>
    %c256_i32 = arith.constant 256 : i32
    %8 = arith.muli %arg1, %c256_i32 : i32
    %9 = vector.broadcast %8 : i32 to vector<1x256xi32>
    %10 = arith.addi %9, %7 : vector<1x256xi32>
    %c256_i32_6 = arith.constant 256 : i32
    %11 = vector.broadcast %c256_i32_6 : i32 to vector<1x256xi32>
    %12 = arith.cmpi slt, %10, %11 : vector<1x256xi32>
    %c0_i32_7 = arith.constant 0 : i32
    %13 = vector.broadcast %c0_i32_7 : i32 to vector<1x256xi32>
    %14 = arith.cmpi sge, %6, %13 : vector<1x256xi32>
    %c255_i32 = arith.constant 255 : i32
    %15 = vector.broadcast %c255_i32 : i32 to vector<1x256xi32>
    %16 = arith.cmpi ne, %6, %15 : vector<1x256xi32>
    %17 = arith.andi %14, %16 : vector<1x256xi1>
    %18 = arith.andi %17, %12 : vector<1x256xi1>
    %cst = arith.constant dense<0xFF800000> : vector<256xf32>
    %19 = vector.multi_reduction <maximumf>, %4, %cst [0] : vector<4x256xf32> to vector<256xf32>
    %20 = vector.shape_cast %19 : vector<256xf32> to vector<1x256xf32>
    %21 = vector.broadcast %20 : vector<1x256xf32> to vector<4x256xf32>
    %22 = arith.subf %4, %21 : vector<4x256xf32>
    %23 = math.exp %22 : vector<4x256xf32>
    %cst_8 = arith.constant dense<0.000000e+00> : vector<256xf32>
    %24 = vector.multi_reduction <add>, %23, %cst_8 [0] : vector<4x256xf32> to vector<256xf32>
    %25 = vector.shape_cast %24 : vector<256xf32> to vector<1x256xf32>
    %26 = math.log %25 : vector<1x256xf32>
    %27 = arith.addf %20, %26 : vector<1x256xf32>
    %28 = tpu.iota {dimensions = array<i32: 0>} : vector<4x256xi32>
    %29 = vector.broadcast %6 : vector<1x256xi32> to vector<4x256xi32>
    %30 = arith.cmpi eq, %28, %29 : vector<4x256xi32>
    %cst_9 = arith.constant 0.000000e+00 : f32
    %31 = vector.broadcast %cst_9 : f32 to vector<4x256xf32>
    %32 = arith.select %30, %4, %31 : vector<4x256xi1>, vector<4x256xf32>
    %cst_10 = arith.constant dense<0.000000e+00> : vector<256xf32>
    %33 = vector.multi_reduction <add>, %32, %cst_10 [0] : vector<4x256xf32> to vector<256xf32>
    %34 = vector.shape_cast %33 : vector<256xf32> to vector<1x256xf32>
    %35 = arith.subf %27, %34 : vector<1x256xf32>
    %cst_11 = arith.constant 0.000000e+00 : f32
    %36 = vector.broadcast %cst_11 : f32 to vector<1x256xf32>
    %37 = arith.select %18, %35, %36 : vector<1x256xi1>, vector<1x256xf32>
    %c0_12 = arith.constant 0 : index
    %c0_13 = arith.constant 0 : index
    %c0_14 = arith.constant 0 : index
    %38 = vector.load %arg4[%c0_12, %c0_13, %c0_14] : memref<1x1x256xf32, #tpu.memory_space<vmem>>, vector<1x1x256xf32>
    %39 = vector.shape_cast %37 : vector<1x256xf32> to vector<1x1x256xf32>
    %40 = arith.addf %38, %39 : vector<1x1x256xf32>
    %c0_15 = arith.constant 0 : index
    %c0_16 = arith.constant 0 : index
    %c0_17 = arith.constant 0 : index
    %41 = vector.load %arg4[%c0_15, %c0_16, %c0_17] : memref<1x1x256xf32, #tpu.memory_space<vmem>>, vector<1x1x256xf32>
    tpu.vector_store %arg4[%c0_15, %c0_16, %c0_17], %40 {strides = array<i32>} : memref<1x1x256xf32, #tpu.memory_space<vmem>>, vector<1x1x256xf32>,
    %c0_18 = arith.constant 0 : index
    %c0_19 = arith.constant 0 : index
    %c0_20 = arith.constant 0 : index
    %42 = vector.load %arg5[%c0_18, %c0_19, %c0_20] : memref<1x1x256xi32, #tpu.memory_space<vmem>>, vector<1x1x256xi32>
    %43 = vector.shape_cast %18 : vector<1x256xi1> to vector<1x1x256xi1>
    %44 = arith.extui %43 : vector<1x1x256xi1> to vector<1x1x256xi32>
    %45 = arith.addi %42, %44 : vector<1x1x256xi32>
    %c0_21 = arith.constant 0 : index
    %c0_22 = arith.constant 0 : index
    %c0_23 = arith.constant 0 : index
    %46 = vector.load %arg5[%c0_21, %c0_22, %c0_23] : memref<1x1x256xi32, #tpu.memory_space<vmem>>, vector<1x1x256xi32>
    tpu.vector_store %arg5[%c0_21, %c0_22, %c0_23], %45 {strides = array<i32>} : memref<1x1x256xi32, #tpu.memory_space<vmem>>, vector<1x1x256xi32>,
    return
  }
  func.func @transform_0(%arg0: i32, %arg1: i32) -> (i32, i32, i32) {
    %c0_i32 = arith.constant 0 : i32
    %c0_i32_0 = arith.constant 0 : i32
    return %arg0, %c0_i32, %arg1 : i32, i32, i32
  }
  func.func @transform_1(%arg0: i32, %arg1: i32) -> (i32, i32, i32) {
    %c0_i32 = arith.constant 0 : i32
    %c0_i32_0 = arith.constant 0 : i32
    return %arg0, %c0_i32, %arg1 : i32, i32, i32
  }
  func.func @transform_2(%arg0: i32, %arg1: i32) -> (i32, i32, i32) {
    %c0_i32 = arith.constant 0 : i32
    %c0_i32_0 = arith.constant 0 : i32
    %c0_i32_1 = arith.constant 0 : i32
    return %arg0, %c0_i32, %c0_i32_0 : i32, i32, i32
  }
  func.func @transform_3(%arg0: i32, %arg1: i32) -> (i32, i32, i32) {
    %c0_i32 = arith.constant 0 : i32
    %c0_i32_0 = arith.constant 0 : i32
    %c0_i32_1 = arith.constant 0 : i32
    return %arg0, %c0_i32, %c0_i32_0 : i32, i32, i32
  }
}

</mosaic_0001>

<bundles_post_ra>
// kernel: tpu_custom_call.1
= control target key start
LH: loop header
LB: loop body
LE: loop exit
PB: predicated region body
PF: predicated region fallthrough
CT: control target
= control target key end

     0   :  { %9 = vsyncpa [#allocation3], 0  ;;  %s1156_s0 = inlined_call_operand.hbm [shape: f32[2,4,256], index: 0, kind: input, shape index: {}]   ;;  %s1157_s1 = inlined_call_operand.hbm [shape: s32[2,1,256], index: 1, kind: input, shape index: {}]   ;;  %s1158_s2 = inlined_call_operand.hbm [shape: f32[2,1,256], index: 2, kind: output, shape index: {0}]   ;;  %s1159_s3 = inlined_call_operand.hbm [shape: s32[2,1,256], index: 3, kind: output, shape index: {1}]  }
   0x1   :  { %11 = vsyncpa [#allocation3 + $0x1], 0 }
   0x2   :  { %12 = vsyncpa [#allocation6], 0 }
   0x3   :  { %14 = vsyncpa [#allocation6 + $0x1], 0 }
   0x4   :  { %15 = vsyncpa [#allocation4], 0 }
   0x5   :  { %17 = vsyncpa [#allocation4 + $0x1], 0 }
   0x6   :  { %18 = vsyncpa [#allocation9], 0 }
   0x7   :  { %20 = vsyncpa [#allocation9 + $0x1], 0  ;;  %s892_s12 = smov 0   ;;  %s894_s13 = smov 0  }
   0x8   :  { %s896_s14 = smov 0   ;;  %s898_s15 = smov 0  }
   0x9   :  { %s900_s16 = smov 0   ;;  %s902_s17 = smov 0  }
   0xa LB: > { %s582_s18 = sadd.s32 4294967295, %s862_s17   ;;  %s583_s19 = sadd.s32 4294967294, %s862_s17   ;;  %s862_s17 = sphi %s902_s17, %s26_s17   ;;  %s858_s16 = sphi %s900_s16, %s1175_s16   ;;  %s854_s15 = sphi %s898_s15, %s1174_s15   ;;  %s850_s14 = sphi %s896_s14, %s1173_s14   ;;  %s846_s13 = sphi %s894_s13, %s1172_s13   ;;  %s842_s12 = sphi %s892_s12, %s1171_s12  }
   0xb   : > { %s38_s20 = sadd.s32 1, %s858_s16  ;;  %s47_s21 = sadd.s32 1, %s850_s14 }
   0xc   : > { %p40_p0 = scmp.ge.s32.totalorder %s38_s20, 2  ;;  %p54_p1 = scmp.ne.s32.totalorder %s850_s14, %s846_s13 }
   0xd   : > { %p55_p2 = scmp.eq.s32.totalorder %s862_s17, 0  ;;  %p60_p3 = scmp.ne.s32.totalorder %s846_s13, %s842_s12 }
   0xe   : > { %s1177_s20 = smov (%p40_p0, %s38_s20), 0  ;;  %p61_p5 = scmp.eq.s32.totalorder %s582_s18, 0 }
   0xf   : > { %p933_p4 = por %p55_p2, %p54_p1  ;;  %s42_s23 = ssub.s32 %s858_s16, %s1177_s20 }
  0x10   : > { %p112_p6 = scmp.eq.s32.totalorder %s582_s18, 1  ;;  %p45_p7 = scmp.eq.s32.totalorder %s42_s23, 0 }
  0x11   : > { %p939_p8 = por %p61_p5, %p60_p3  ;;  %p118_p10 = scmp.eq.s32.totalorder %s583_s19, 1 }
  0x12   : > { %p943_p9 = por %p112_p6, %p54_p1  ;;  %p631_p13 = scmp.lt.s32.totalorder %s862_s17, 2 }
  0x13   : > { %s948_s26 = scalar_select %p45_p7, %s850_s14, %s47_s21  }
  0x14   : > { %p950_p11 = por %p118_p10, %p60_p3  ;;  %s957_s28 = sand.u32 1, %s850_s14  }
  0x15   : > { %s586_s29 = sshll.u32 %s957_s28, 3  ;;  %s605_s30 = sshll.u32 %s858_s16, 7 }
  0x16   : > { %s176_s6 = scalar_lea.hbm %s1156_s0, %s605_s30  ;;  %s168_s7 = scalar_lea.vmem [#allocation2], %s586_s29 }
  0x17   : > { %s178_s8 = sshll.u32 %s168_s7, 4  ;;  %p966_p0 = pnand %p631_p13, %p933_p4  ;;  %s179_s8 = int_to_ptr.vmem [resolvable:$true] %s178_s8 }
  0x18   : > { %p592_p1 = scmp.ge.s32.totalorder %s862_s17, 1  ;;  %p204_p2 = scmp.lt.s32.totalorder %s862_s17, 3 }
  0x19   : > { %s165_s10 = scalar_lea.sflag [#allocation3], %s957_s28  ;;  %p694_p3 = pneg %p966_p0 }
  0x1a   : > { %s705_s11 = scalar_lea.vmem %s179_s8, 128  ;;  %s864_s18 = smov [#allocation2]  }
  0x1b   : > { %p706_p5 = scmp.ne.s32.totalorder %s179_s8, %s705_s11  ;;  %s710_s19 = sshll.u32 %s864_s18, 4  ;;  %s711_s19 = int_to_ptr.vmem [resolvable:$false] %s710_s19 }
  0x1c   : > { %s712_s21 = scalar_lea.vmem %s711_s19, 256  ;;  %p713_p4 = scmp.lt.s32.totalorder %s179_s8, %s711_s19 }
  0x1d   : > { %p708_p6 = pnand %p706_p5, %p694_p3  ;;  %p714_p10 = scmp.lt.s32.totalorder %s712_s21, %s705_s11 }
  0x1f   : > { %p709_p7 = pneg %p708_p6  ;;  %p715_p13 = por %p714_p10, %p713_p4 }
  0x21   : > { %p716_p12 = pnand %p715_p13, %p709_p7 }
  0x23   : > { %719 = shalt.err (!%p716_p12)
}
  0x24   : > { %620 = dma.hbm_to_vmem [thread:$0]  (!%p966_p0), %s176_s6, 128, %s179_s8, %s165_s10  }
  0x25   : > { %p984_p5 = pnand %p592_p1, %p204_p2  ;;  %s589_s23 = sshll.u32 %s957_s28, 1 }
  0x26   : > { %s606_s29 = sshll.u32 %s858_s16, 5  ;;  %s189_s7 = scalar_lea.vmem [#allocation5], %s589_s23 }
  0x27   : > { %s197_s5 = scalar_lea.hbm %s1157_s1, %s606_s29  ;;  %s199_s11 = sshll.u32 %s189_s7, 4  ;;  %s200_s11 = int_to_ptr.vmem [resolvable:$true] %s199_s11 }
  0x28   : > { %s186_s18 = scalar_lea.sflag [#allocation6], %s957_s28  ;;  %s733_s19 = scalar_lea.vmem %s200_s11, 32 }
  0x29   : > { %p734_p12 = scmp.ne.s32.totalorder %s200_s11, %s733_s19  ;;  %s865_s6 = smov [#allocation5]  }
  0x2a   : > { %s738_s8 = sshll.u32 %s865_s6, 4  ;;  %s739_s8 = int_to_ptr.vmem [resolvable:$false] %s738_s8 }
  0x2b   : > { %p736_p6 = pnand %p734_p12, %p694_p3  ;;  %s740_s10 = scalar_lea.vmem %s739_s8, 64 }
  0x2c   : > { %p741_p1 = scmp.lt.s32.totalorder %s200_s11, %s739_s8  ;;  %p742_p2 = scmp.lt.s32.totalorder %s740_s10, %s733_s19 }
  0x2d   : > { %p737_p7 = pneg %p736_p6 }
  0x2e   : > { %p743_p4 = por %p742_p2, %p741_p1 }
  0x30   : > { %p744_p10 = pnand %p743_p4, %p737_p7 }
  0x32   : > { %747 = shalt.err (!%p744_p10)
}
  0x33   : > { %623 = dma.hbm_to_vmem [thread:$0]  (!%p966_p0), %s197_s5, 32, %s200_s11, %s186_s18  }
  0x34   : > { %208 = sbr.rel (%p984_p5) target bundleno = 170 (0xaa), region = 28  ;;  %s1002_s28 = sand.u32 (!%p984_p5), 1, %s846_s13  }
  0x35   : > { %s593_s21 = sshll.u32 (!%p984_p5), %s1002_s28, 3  ;;  %s211_s23 = scalar_lea.sflag (!%p984_p5), [#allocation3], %s1002_s28 }
  0x36   : > { %s214_s29 = scalar_lea.vmem (!%p984_p5), [#allocation2], %s593_s21 }
  0x39   : > { %825 = dma.done.wait (%p939_p8), %s211_s23, 128  }
  0x3a   : > { %827 = vsyncadd (%p939_p8), %s211_s23, 4294967168  ;;  %s594_s9 = sshll.u32 %s1002_s28, 1  ;;  %s220_s22 = scalar_lea.sflag [#allocation6], %s1002_s28 }
  0x3b   : > { %s223_s30 = scalar_lea.vmem [#allocation5], %s594_s9 }
  0x3c   : > { %829 = dma.done.wait (%p939_p8), %s220_s22, 32  }
  0x3d   : > { %831 = vsyncadd (%p939_p8), %s220_s22, 4294967264  ;;  %v262_v0 = vlaneseq  ;;  %v866_v2 = vmov 1966171168   ;;  %s1020_s4 = scalar_lea.vmem [#allocation7], %s594_s9  ;;  %v867_v4 = vmov 0.0   ;;  %s1025_s5 = scalar_lea.vmem [#allocation8], %s594_s9 }
  0x3e   : > { %v286_v3 = vunpack.c.l.s4 %v866_v2  ;;  %v868_v5 = vmov 0   ;;  %v869_v7 = vmov 1   ;;  %vm304_vm1 = vcmask 1043456   ;;  %v1035_v11 = vld [vmem:[%s214_s29] sm:$0xff]  ;;  %v1037_v12 = vld [vmem:[%s223_s30] sm:$0x3] }
  0x3f   : > { %vm1016_vm0 = vcmp.lt.s32.totalorder %v262_v0, 256  ;;  %v1030_v6 = vshrl.u32 %v262_v0, 7  ;;  %v284_v8 = vcombine.low %v869_v7, %v869_v7  ;;  %vm279_vm2 = vcmp.ge.s32.totalorder %v1037_v12, 0  ;;  %s607_s24 = sshll.u32 %s854_s15, 5  ;;  %s443_s7 = sshll.u32 %s1025_s5, 4  ;;  %s1067_s7 = int_to_ptr.vmem [resolvable:$true] %s443_s7 }
  0x40   : > { %266 = vst.msk [vmem:[%s1020_s4] sm:$0x3] %vm1016_vm0, %v867_v4  ;;  %267 = vst.msk [vmem:[%s1025_s5] sm:$0x3] %vm1016_vm0, %v868_v5  ;;  %v287_v9 = vunpack.c.0.s8 %v286_v3  ;;  %vm280_vm3 = vcmp.ne.s32.totalorder %v1037_v12, 255  ;;  %v1044_v14 = vcombine.high %v1035_v11, %v1035_v11  ;;  %v305_v15 = vsel %vm304_vm1, %v1035_v11, -inf  ;;  %s1065_s19 = scalar_lea.hbm %s1159_s3, %s607_s24 }
  0x41   : > { %vm281_vm4 = vmand %vm279_vm2, %vm280_vm3  ;;  %v306_v17 = vrot.slane %v305_v15, 4  ;;  %s415_s6 = scalar_lea.sflag [#allocation9], %s1002_s28  ;;  %s748_s8 = scalar_lea.vmem %s1067_s7, 32 }
  0x42   : > { %v1033_v10 = vsub.s32 %v287_v9, %v1030_v6  ;;  %v312_v18 = vsel %vm304_vm1, %v1044_v14, -inf  ;;  %p749_p8 = scmp.ne.s32.totalorder %s1067_s7, %s748_s8  ;;  %s870_s10 = smov [#allocation8]  }
  0x43   : > { %v313_v19 = vrot.slane %v312_v18, 4  ;;  %v307_v20 = vmax.f32 %v305_v15, %v306_v17  ;;  %s752_s21 = sshll.u32 %s870_s10, 4  ;;  %s753_s21 = int_to_ptr.vmem [resolvable:$false] %s752_s21 }
  0x44   : > { %v291_v13 = vrot.slane %v284_v8, %v1033_v10  ;;  %p750_p0 = pnand %p749_p8, %p943_p9  ;;  %s754_s23 = scalar_lea.vmem %s753_s21, 64 }
  0x45   : > { %v314_v23 = vmax.f32 %v312_v18, %v313_v19  ;;  %v308_v24 = vrot.slane %v307_v20, 2  ;;  %p755_p13 = scmp.lt.s32.totalorder %s1067_s7, %s753_s21  ;;  %p756_p5 = scmp.lt.s32.totalorder %s754_s23, %s748_s8 }
  0x46   : > { %v298_v16 = vrot.slane %v291_v13, %v1033_v10  ;;  %p751_p3 = pneg %p750_p0 }
  0x47   : > { %v405_v21 = vld [vmem:[%s1025_s5] sm:$0x3]  ;;  %v315_v26 = vrot.slane %v314_v23, 2  ;;  %v309_v28 = vmax.f32 %v307_v20, %v308_v24  ;;  %p757_p12 = por %p756_p5, %p755_p13 }
  0x48   : > { %vm299_vm5 = vcmp.ne.s32.totalorder %v298_v16, 0 }
  0x49   : > { %vm1054_vm6 = vmand %vm281_vm4, %vm299_vm5  ;;  %v316_v29 = vmax.f32 %v314_v23, %v315_v26  ;;  %v310_v30 = vrot.slane %v309_v28, 1  ;;  %p758_p6 = pnand %p757_p12, %p751_p3 }
  0x4a   : > { %v406_v25 = vsel %vm1054_vm6, 1, %v868_v5 }
  0x4b   : > { %v407_v27 = vadd.s32 %v406_v25, %v405_v21 }
  0x4d   : > { %408 = vst.msk [vmem:[%s1025_s5] sm:$0x3] %vm1016_vm0, %v407_v27 }
  0x4e   : > { %761 = shalt.err (!%p758_p6)
}
  0x4f   : > { %s762_s29 = scalar_lea.hbm %s1065_s19, 32  ;;  %s766_s30 = scalar_lea.hbm %s1159_s3, 64 }
  0x50   : > { %p763_p7 = scmp.ne.s32.totalorder %s1065_s19, %s762_s29  ;;  %p767_p4 = scmp.lt.s32.totalorder %s1065_s19, %s1159_s3 }
  0x51   : > { %p768_p10 = scmp.lt.s32.totalorder %s766_s30, %s762_s29 }
  0x52   : > { %p764_p1 = pnand %p763_p7, %p943_p9 }
  0x53   : > { %p769_p8 = por %p768_p10, %p767_p4 }
  0x54   : > { %p765_p2 = pneg %p764_p1 }
  0x56   : > { %p770_p0 = pnand %p769_p8, %p765_p2 }
  0x58   : > { %773 = shalt.err (!%p770_p0)
}
  0x59   : > { %614 = dma.vmem_to_hbm [thread:$0]  (%p943_p9), %s1067_s7, 32, %s1065_s19, %s415_s6   ;;  %v317_v31 = vrot.slane %v316_v29, 1  ;;  %v311_v32 = vmax.f32 %v309_v28, %v310_v30  ;;  %v353_v37 = vsub.s32 0, %v1030_v6  ;;  %v357_v38 = vsub.s32 1, %v1030_v6  ;;  %v398_v21 = vld [vmem:[%s1020_s4] sm:$0x3] }
  0x5a   : > { %s429_s7 = sshll.u32 %s1020_s4, 4  ;;  %s427_s6 = scalar_lea.hbm %s1158_s2, %s607_s24  ;;  %s430_s7 = int_to_ptr.vmem [resolvable:$true] %s429_s7 }
  0x5b   : > { %v318_v33 = vmax.f32 %v316_v29, %v317_v31  ;;  %v354_v39 = vrot.slane %v1037_v12, %v353_v37  ;;  %v358_v40 = vrot.slane %v1037_v12, %v357_v38  ;;  %s410_s8 = scalar_lea.sflag [#allocation4], %s1002_s28  ;;  %s774_s10 = scalar_lea.vmem %s430_s7, 32 }
  0x5c   : > { %p775_p3 = scmp.ne.s32.totalorder %s430_s7, %s774_s10  ;;  %s871_s21 = smov [#allocation7]  }
  0x5d   : > { %v321_v34 = vcombine.low %v311_v32, %v318_v33  ;;  %vm359_vm7 = vcmp.eq.s32.totalorder %v1030_v6, %v354_v39  ;;  %vm360_vm8 = vcmp.eq.s32.totalorder %v1030_v6, %v358_v40  ;;  %s778_s23 = sshll.u32 %s871_s21, 4  ;;  %s779_s23 = int_to_ptr.vmem [resolvable:$false] %s778_s23 }
  0x5e   : > { %v361_v45 = vsel %vm359_vm7, %v1035_v11, 0.0  ;;  %v362_v49 = vsel %vm360_vm8, %v1044_v14, 0.0  ;;  %p776_p13 = pnand %p775_p3, %p943_p9  ;;  %s780_s29 = scalar_lea.vmem %s779_s23, 64 }
  0x5f   : > { %v323_v35 = vsub.f32 %v1035_v11, %v321_v34  ;;  %v363_v50 = vsel %vm304_vm1, %v361_v45, 0.0  ;;  %v370_v53 = vsel %vm304_vm1, %v362_v49, 0.0  ;;  %p781_p12 = scmp.lt.s32.totalorder %s430_s7, %s779_s23  ;;  %p782_p6 = scmp.lt.s32.totalorder %s780_s29, %s774_s10 }
  0x60   : > { %v364_v56 = vrot.slane %v363_v50, 4  ;;  %v371_v59 = vrot.slane %v370_v53, 4  ;;  %p777_p5 = pneg %p776_p13 }
  0x61   : > { %v324_v36 = vmul.f32 1.442695, %v323_v35  ;;  %p783_p7 = por %p782_p6, %p781_p12 }
  0x62   : > { %v365_v62 = vadd.f32 %v364_v56, %v363_v50  ;;  %v372_v0 = vadd.f32 %v371_v59, %v370_v53 }
  0x63   : > { %686 = vpow2.f32 %v324_v36  ;;  %p784_p1 = pnand %p783_p7, %p777_p5 }
  0x64   : > { %v366_v2 = vrot.slane %v365_v62, 2  ;;  %v373_v3 = vrot.slane %v372_v0, 2 }
  0x66   : > { %v367_v4 = vadd.f32 %v366_v2, %v365_v62  ;;  %v374_v5 = vadd.f32 %v373_v3, %v372_v0 }
  0x68   : > { %v368_v6 = vrot.slane %v367_v4, 1  ;;  %v375_v7 = vrot.slane %v374_v5, 1 }
  0x6a   : > { %v369_v11 = vadd.f32 %v368_v6, %v367_v4  ;;  %v376_v15 = vadd.f32 %v375_v7, %v374_v5 }
  0x70   : > { %v687_v41 = vpop.eup %686 }
  0x71   : > { %v327_v42 = vcombine.high %v687_v41, %v687_v41  ;;  %v329_v43 = vsel %vm304_vm1, %v687_v41, 0.0 }
  0x72   : > { %v330_v44 = vrot.slane %v329_v43, 4 }
  0x73   : > { %v336_v46 = vsel %vm304_vm1, %v327_v42, 0.0 }
  0x74   : > { %v331_v47 = vadd.f32 %v330_v44, %v329_v43  ;;  %v337_v48 = vrot.slane %v336_v46, 4 }
  0x76   : > { %v332_v51 = vrot.slane %v331_v47, 2  ;;  %v338_v52 = vadd.f32 %v337_v48, %v336_v46 }
  0x78   : > { %v333_v54 = vadd.f32 %v332_v51, %v331_v47  ;;  %v339_v55 = vrot.slane %v338_v52, 2 }
  0x7a   : > { %v334_v57 = vrot.slane %v333_v54, 1  ;;  %v340_v58 = vadd.f32 %v339_v55, %v338_v52 }
  0x7c   : > { %v335_v60 = vadd.f32 %v334_v57, %v333_v54  ;;  %v341_v61 = vrot.slane %v340_v58, 1 }
  0x7e   : > { %v342_v63 = vadd.f32 %v341_v61, %v340_v58  ;;  %688 = vlog2.f32 %v335_v60 }
  0x80   : > { %690 = vlog2.f32 %v342_v63 }
  0x8b   : > { %v689_v8 = vpop.eup %688 }
  0x8c   : > { %v344_v9 = vmul.f32 0.6931472, %v689_v8 }
  0x8d   : > { %v691_v12 = vpop.eup %690 }
  0x8e   : > { %v346_v13 = vmul.f32 0.6931472, %v691_v12  ;;  %v347_v14 = vadd.f32 %v344_v9, %v311_v32 }
  0x90   : > { %v348_v16 = vadd.f32 %v346_v13, %v318_v33  ;;  %v377_v17 = vsub.f32 %v347_v14, %v369_v11 }
  0x92   : > { %v378_v18 = vsub.f32 %v348_v16, %v376_v15 }
  0x94   : > { %v381_v19 = vcombine.low %v377_v17, %v378_v18 }
  0x96   : > { %v388_v20 = vrot.slane %v381_v19, %v1033_v10 }
  0x98   : > { %v395_v23 = vrot.slane %v388_v20, %v1033_v10 }
  0x9a   : > { %v397_v24 = vsel %vm1054_vm6, %v395_v23, 0.0 }
  0x9b   : > { %v399_v25 = vadd.f32 %v398_v21, %v397_v24 }
  0x9d   : > { %404 = vst.msk [vmem:[%s1020_s4] sm:$0x3] %vm1016_vm0, %v399_v25 }
  0x9e   : > { %787 = shalt.err (!%p784_p1)
}
  0x9f   : > { %s788_s15 = scalar_lea.hbm %s427_s6, 32  ;;  %s792_s24 = scalar_lea.hbm %s1158_s2, 64 }
  0xa0   : > { %p789_p2 = scmp.ne.s32.totalorder %s427_s6, %s788_s15  ;;  %p793_p8 = scmp.lt.s32.totalorder %s427_s6, %s1158_s2 }
  0xa1   : > { %p794_p0 = scmp.lt.s32.totalorder %s792_s24, %s788_s15 }
  0xa2   : > { %p790_p4 = pnand %p789_p2, %p943_p9 }
  0xa3   : > { %p795_p3 = por %p794_p0, %p793_p8 }
  0xa4   : > { %p791_p10 = pneg %p790_p4 }
  0xa6   : > { %p796_p13 = pnand %p795_p3, %p791_p10 }
  0xa8   : > { %799 = shalt.err (!%p796_p13)
}
  0xa9   : > { %613 = dma.vmem_to_hbm [thread:$0]  (%p943_p9), %s430_s7, 32, %s427_s6, %s410_s8  }
  0xaa PF: > { %s455_s30 = sand.u32 1, %s842_s12   ;;  %p1170_p5 = scmp.ge.s32.totalorder %s862_s17, 2 }
  0xab   : > { %s456_s5 = scalar_lea.sflag [#allocation4], %s455_s30 }
  0xac   : > { %p625_p12 = pnand %p1170_p5, %p950_p11 }
  0xae   : > { %p626_p6 = pneg %p625_p12 }
  0xb0   : > { %833 = dma.done.wait (%p626_p6), %s456_s5, 32  }
  0xb1   : > { %835 = vsyncadd (%p626_p6), %s456_s5, 4294967264  ;;  %s465_s11 = scalar_lea.sflag [#allocation9], %s455_s30 }
  0xb2   : > { %837 = dma.done.wait (%p626_p6), %s465_s11, 32  }
  0xb3   : > { %839 = vsyncadd (%p626_p6), %s465_s11, 4294967264  ;;  %s26_s17 = sadd.s32 1, %s862_s17   ;;  %s1171_s12 = smov %s846_s13 }
  0xb4   : > { %p23_p7 = scmp.ge.s32.totalorder %s26_s17, 4   ;;  %s1172_s13 = smov %s850_s14 }
  0xb5   : > { %s1173_s14 = smov %s948_s26  ;;  %s1174_s15 = smov %s858_s16 }
  0xb6   : > { %s1175_s16 = smov %s1177_s20  ;;  %25 = sbr.rel (!%p23_p7) target bundleno = 10 (0xa), region = 107 }
  0xbb   :  { %470 = vsyncpa [#allocation3], 1 }
  0xbc   :  { %472 = vsyncpa [#allocation3 + $0x1], 1 }
  0xbd   :  { %473 = vsyncpa [#allocation6], 1 }
  0xbe   :  { %475 = vsyncpa [#allocation6 + $0x1], 1 }
  0xbf   :  { %476 = vsyncpa [#allocation4], 1 }
  0xc0   :  { %478 = vsyncpa [#allocation4 + $0x1], 1 }
  0xc1   :  { %479 = vsyncpa [#allocation9], 1 }
  0xc2   :  { %481 = vsyncpa [#allocation9 + $0x1], 1 }

</bundles_post_ra>
